<compile_context>
chip_gen: v7x
topology: tpu7x:2x2x1
jax: 0.10.0
libtpu: 0.0.40
codegen_flags: <defaults>
</compile_context>

<pallas_src>
import jax
import jax.numpy as jnp
from jax.experimental import pallas as pl
from jax.experimental.pallas import tpu as pltpu


def _add_negate_kernel(a_ref, b_ref, o_ref):
    # Elementwise hot path: out = -(a + bias), all in VMEM on the VPU.
    o_ref[...] = -(a_ref[...] + b_ref[...])


def _ceil_to(n: int, m: int) -> int:
    return -(-n // m) * m


def _sublane_count(itemsize: int) -> int:
    # f32 -> 8 rows/vreg, bf16 -> 16, int8/fp8 -> 32.
    return max(8, 32 // max(1, itemsize))


def _num_cores_hint() -> int:
    """Heuristic TensorCores-per-chip (v7x has 2)."""
    try:
        kind = jax.devices()[0].device_kind.lower()
    except Exception:
        return 1
    return 2 if ("v7" in kind or "tpu7" in kind) else 1


def _tile_budget_bytes() -> int:
    """Per-tile VMEM budget so 3 streams x 2 buffers fit the scoped default."""
    try:
        kind = jax.devices()[0].device_kind.lower()
    except Exception:
        return 2 << 20
    if any(v in kind for v in ("v2", "v3", "v4", "v5")):
        return 2 << 20          # 16 MiB scoped default -> 6 x 2 MiB = 12 MiB
    return 4 << 20              # v6e / v7x: 32 MiB scoped -> 6 x 4 MiB = 24 MiB


def _pick_lane_layout(total: int, sublane: int, max_lanes: int = 1024):
    """(rows, lanes) with lanes a multiple of 128 and rows a multiple of the
    dtype sublane count, preferring wide lanes. None if nothing fits."""
    for lanes in (1024, 512, 256, 128):
        if lanes > max_lanes or total % lanes:
            continue
        rows = total // lanes
        if rows >= sublane and rows % sublane == 0:
            return rows, lanes
    return None


def _pick_tile_rows(rows: int, lanes: int, itemsize: int, sublane: int,
                    budget_bytes: int) -> int:
    """Rows per block: ~budget_bytes per tile, sublane-aligned, preferring an
    exact divisor of `rows` so every block (and every store) is full-width."""
    bytes_per_row = lanes * itemsize
    max_rows = max(sublane, (budget_bytes // bytes_per_row) // sublane * sublane)
    if rows <= max_rows:
        return rows                      # single full-extent block
    # Largest exact divisor of rows (in sublane units) not exceeding max_rows.
    units = rows // sublane              # rows is a multiple of sublane
    best_units = 1
    for u in range(max_rows // sublane, 0, -1):
        if units % u == 0:
            best_units = u
            break
    tile_r = best_units * sublane
    # Pathological (e.g. rows/sublane is a large prime): accept one ragged
    # last block rather than thousands of tiny grid steps.
    if tile_r * 4 < max_rows:
        tile_r = max_rows
    return tile_r


def test_add_forward(a: jax.Array, bias: jax.Array, *,
                     donate_input: bool = False) -> jax.Array:
    """Pallas implementation of TestAdd.forward: -(a + bias)."""
    if bias.dtype != a.dtype:
        bias = bias.astype(a.dtype)
    if bias.shape != a.shape:
        # TODO(synk): for a small broadcastable bias, keep it resident in VMEM
        # (constant index_map) instead of materializing a full-size copy; that
        # cuts HBM traffic from 3N to ~2N.
        bias = jnp.broadcast_to(bias, a.shape)

    orig_shape = a.shape
    total = a.size
    itemsize = jnp.dtype(a.dtype).itemsize
    sublane = _sublane_count(itemsize)

    layout = _pick_lane_layout(total, sublane)
    pad = 0
    if layout is not None:
        rows, lanes = layout
        a2 = a.reshape(rows, lanes)
        b2 = bias.reshape(rows, lanes)
    else:
        # Pad the flattened array up to a whole number of (sublane, 128) tiles
        # and run the same lane-dense tiled path; slice the result afterwards.
        lanes = 128
        rows = _ceil_to(pl.cdiv(total, lanes), sublane)
        pad = rows * lanes - total
        a2 = jnp.pad(a.reshape(-1), (0, pad)).reshape(rows, lanes)
        b2 = jnp.pad(bias.reshape(-1), (0, pad)).reshape(rows, lanes)

    tile_r = _pick_tile_rows(rows, lanes, itemsize, sublane,
                             _tile_budget_bytes())

    # On 2-TensorCore chips (v7x), avoid a grid of length 1 for mid-size
    # tensors so the "parallel" axis can give each core its own DMA stream.
    if (_num_cores_hint() >= 2 and tile_r == rows
            and rows * lanes * itemsize >= (1 << 20)
            and rows % (2 * sublane) == 0):
        tile_r = rows // 2

    grid = (pl.cdiv(rows, tile_r),)
    block = pl.BlockSpec((tile_r, lanes), lambda i: (i, 0))

    io_aliases = {0: 0} if donate_input else {}

    out2 = pl.pallas_call(
        _add_negate_kernel,
        out_shape=jax.ShapeDtypeStruct((rows, lanes), a.dtype),
        grid=grid,
        in_specs=[block, block],
        out_specs=block,
        input_output_aliases=io_aliases,
        compiler_params=pltpu.CompilerParams(
            # Independent row tiles: let megacore (v7x) shard the grid.
            dimension_semantics=("parallel",),
        ),
    )(a2, b2)

    if pad:
        return out2.reshape(-1)[:total].reshape(orig_shape)
    return out2.reshape(orig_shape)


if __name__ == "__main__":
    key = jax.random.PRNGKey(0)
    k_a, k_b = jax.random.split(key)

    # Small NCHW shapes consistent with the module: batch=2, channels=4, 16x16.
    shape = (2, 4, 16, 16)
    a = jax.random.normal(k_a, shape, dtype=jnp.float32)
    bias = jax.random.normal(k_b, shape, dtype=jnp.float32)  # fixed parameter

    # Reference (computed first, independent of any buffer donation).
    ref = -(a + bias)

    out = test_add_forward(a, bias)
    out = jax.block_until_ready(out)

    assert out.shape == shape and out.dtype == jnp.float32
    assert jnp.allclose(out, ref, atol=1e-6, rtol=1e-6)

    print("KERNEL_OK")
</pallas_src>

<mosaic_0001>
module attributes {stable_mosaic.version = 11 : i64} {
  func.func @_add_negate_kernel(%arg0: i32, %arg1: memref<8x256xf32, #tpu.memory_space<vmem>>, %arg2: memref<8x256xf32, #tpu.memory_space<vmem>>, %arg3: memref<8x256xf32, #tpu.memory_space<vmem>>) attributes {dimension_semantics = [#tpu.dimension_semantics<parallel>], iteration_bounds = array<i64: 1>, scalar_prefetch = 0 : i64, scratch_operands = 0 : i64, tpu.core_type = #tpu.core_type<tc>, window_params = [{transform_indices = @transform_0, window_bounds = array<i64: 8, 256>}, {transform_indices = @transform_1, window_bounds = array<i64: 8, 256>}, {transform_indices = @transform_2, window_bounds = array<i64: 8, 256>}]} {
    %c0 = arith.constant 0 : index
    %c0_0 = arith.constant 0 : index
    %0 = vector.load %arg1[%c0, %c0_0] : memref<8x256xf32, #tpu.memory_space<vmem>>, vector<8x256xf32>
    %c0_1 = arith.constant 0 : index
    %c0_2 = arith.constant 0 : index
    %1 = vector.load %arg2[%c0_1, %c0_2] : memref<8x256xf32, #tpu.memory_space<vmem>>, vector<8x256xf32>
    %2 = arith.addf %0, %1 : vector<8x256xf32>
    %cst = arith.constant 0.000000e+00 : f32
    %3 = vector.broadcast %cst : f32 to vector<8x256xf32>
    %4 = arith.subf %3, %2 : vector<8x256xf32>
    %c0_3 = arith.constant 0 : index
    %c0_4 = arith.constant 0 : index
    %5 = vector.load %arg3[%c0_3, %c0_4] : memref<8x256xf32, #tpu.memory_space<vmem>>, vector<8x256xf32>
    tpu.vector_store %arg3[%c0_3, %c0_4], %4 {strides = array<i32>} : memref<8x256xf32, #tpu.memory_space<vmem>>, vector<8x256xf32>,
    return
  }
  func.func @transform_0(%arg0: i32) -> (i32, i32) {
    %c0_i32 = arith.constant 0 : i32
    %c0_i32_0 = arith.constant 0 : i32
    return %arg0, %c0_i32 : i32, i32
  }
  func.func @transform_1(%arg0: i32) -> (i32, i32) {
    %c0_i32 = arith.constant 0 : i32
    %c0_i32_0 = arith.constant 0 : i32
    return %arg0, %c0_i32 : i32, i32
  }
  func.func @transform_2(%arg0: i32) -> (i32, i32) {
    %c0_i32 = arith.constant 0 : i32
    %c0_i32_0 = arith.constant 0 : i32
    return %arg0, %c0_i32 : i32, i32
  }
}

</mosaic_0001>

<bundles_post_ra>
// kernel: tpu_custom_call.1
= control target key start
LH: loop header
LB: loop body
LE: loop exit
PB: predicated region body
PF: predicated region fallthrough
CT: control target
= control target key end

     0   :  { %7 = vsyncpa [#allocation3], 0  ;;  %s191_s0 = inlined_call_operand.hbm [shape: f32[8,256], index: 0, kind: input, shape index: {}]   ;;  %s192_s1 = inlined_call_operand.hbm [shape: f32[8,256], index: 1, kind: input, shape index: {}]   ;;  %s193_s2 = inlined_call_operand.hbm [shape: f32[8,256], index: 2, kind: output, shape index: {}]  }
   0x1   :  { %8 = vsyncpa [#allocation6], 0 }
   0x2   :  { %9 = vsyncpa [#allocation4], 0  ;;  %s137_s9 = smov [#allocation2]   ;;  %s138_s11 = smov [#allocation5]  }
   0x3   :  { %s16_s10 = sshll.u32 %s137_s9, 4  ;;  %s26_s12 = sshll.u32 %s138_s11, 4  ;;  %s17_s10 = int_to_ptr.vmem [resolvable:$true] %s16_s10  ;;  %s27_s12 = int_to_ptr.vmem [resolvable:$true] %s26_s12 }
   0x4   :  { %s65_s15 = scalar_lea.hbm %s191_s0, 256 }
   0x5   :  { %p66_p0 = scmp.ne.s32.totalorder %s191_s0, %s65_s15  ;;  %p69_p1 = scmp.lt.u32.totalorder %s65_s15, %s191_s0 }
   0x7   :  { %p71_p2 = pnand %p69_p1, %p66_p0 }
   0x9   :  { %74 = shalt.err (!%p71_p2)
}
   0xa   :  { %s75_s20 = scalar_lea.vmem %s17_s10, 256  ;;  %p80_p4 = scmp.lt.s32.totalorder %s17_s10, %s17_s10 }
   0xb   :  { %p76_p3 = scmp.ne.s32.totalorder %s17_s10, %s75_s20  ;;  %p81_p5 = scmp.lt.s32.totalorder %s75_s20, %s75_s20 }
   0xd   :  { %p82_p6 = por %p81_p5, %p80_p4 }
   0xf   :  { %p83_p7 = pnand %p82_p6, %p76_p3 }
  0x11   :  { %86 = shalt.err (!%p83_p7)
}
  0x12   :  { %19 = dma.hbm_to_vmem [thread:$0]  %s191_s0, 256, %s17_s10, [#allocation3]  }
  0x13   :  { %s87_s25 = scalar_lea.hbm %s192_s1, 256 }
  0x14   :  { %p88_p8 = scmp.ne.s32.totalorder %s192_s1, %s87_s25  ;;  %p91_p9 = scmp.lt.u32.totalorder %s87_s25, %s192_s1 }
  0x16   :  { %p93_p10 = pnand %p91_p9, %p88_p8 }
  0x18   :  { %96 = shalt.err (!%p93_p10)
}
  0x19   :  { %s97_s30 = scalar_lea.vmem %s27_s12, 256  ;;  %p102_p12 = scmp.lt.s32.totalorder %s27_s12, %s27_s12 }
  0x1a   :  { %p98_p11 = scmp.ne.s32.totalorder %s27_s12, %s97_s30  ;;  %p103_p13 = scmp.lt.s32.totalorder %s97_s30, %s97_s30 }
  0x1c   :  { %p104_p0 = por %p103_p13, %p102_p12 }
  0x1e   :  { %p105_p1 = pnand %p104_p0, %p98_p11 }
  0x20   :  { %108 = shalt.err (!%p105_p1)
}
  0x21   :  { %29 = dma.hbm_to_vmem [thread:$0]  %s192_s1, 256, %s27_s12, [#allocation6]  }
  0x22   :  { %131 = dma.done.wait [#allocation3], 256  }
  0x23   :  { %132 = vsyncadd [#allocation3], 4294967040 }
  0x24   :  { %133 = dma.done.wait [#allocation6], 256  }
  0x25   :  { %134 = vsyncadd [#allocation6], 4294967040  ;;  %v36_v0 = vld [vmem:[#allocation2] sm:$0xff]  ;;  %v38_v1 = vld [vmem:[#allocation5] sm:$0xff]  ;;  %s139_s4 = smov [#allocation7]  }
  0x26   :  { %v37_v2 = vld [vmem:[#allocation2 + $0x8] sm:$0xff]  ;;  %v40_v3 = vadd.f32 %v38_v1, %v36_v0  ;;  %v39_v4 = vld [vmem:[#allocation5 + $0x8] sm:$0xff]  ;;  %s52_s5 = sshll.u32 %s139_s4, 4  ;;  %s53_s5 = int_to_ptr.vmem [resolvable:$true] %s52_s5 }
  0x27   :  { %v41_v5 = vadd.f32 %v39_v4, %v37_v2  ;;  %s109_s6 = scalar_lea.vmem %s53_s5, 256  ;;  %p114_p3 = scmp.lt.s32.totalorder %s53_s5, %s53_s5 }
  0x28   :  { %v42_v6 = vsub.f32 0.0, %v40_v3  ;;  %p110_p2 = scmp.ne.s32.totalorder %s53_s5, %s109_s6  ;;  %p115_p4 = scmp.lt.s32.totalorder %s109_s6, %s109_s6 }
  0x29   :  { %v43_v7 = vsub.f32 0.0, %v41_v5 }
  0x2a   :  { %44 = vst [vmem:[#allocation7] sm:$0xff] %v42_v6  ;;  %p116_p5 = por %p115_p4, %p114_p3 }
  0x2b   :  { %45 = vst [vmem:[#allocation7 + $0x8] sm:$0xff] %v43_v7 }
  0x2c   :  { %p117_p6 = pnand %p116_p5, %p110_p2 }
  0x2e   :  { %120 = shalt.err (!%p117_p6)
}
  0x2f   :  { %s121_s8 = scalar_lea.hbm %s193_s2, 256 }
  0x30   :  { %p122_p7 = scmp.ne.s32.totalorder %s193_s2, %s121_s8  ;;  %p125_p8 = scmp.lt.u32.totalorder %s121_s8, %s193_s2 }
  0x32   :  { %p127_p9 = pnand %p125_p8, %p122_p7 }
  0x34   :  { %130 = shalt.err (!%p127_p9)
}
  0x35   :  { %55 = dma.vmem_to_hbm [thread:$0]  %s53_s5, 256, %s193_s2, [#allocation4]  }
  0x36   :  { %135 = dma.done.wait [#allocation4], 256  }
  0x37   :  { %136 = vsyncadd [#allocation4], 4294967040 }
  0x38   :  { %59 = vsyncpa [#allocation3], 1 }
  0x39   :  { %60 = vsyncpa [#allocation6], 1 }
  0x3a   :  { %61 = vsyncpa [#allocation4], 1 }

</bundles_post_ra>
